<compile_context>
chip_gen: v7x
topology: tpu7x:2x2x1
jax: 0.10.0
libtpu: 0.0.40
codegen_flags: <defaults>
</compile_context>

<pallas_src>
import jax
import jax.numpy as jnp
from jax import lax
from jax.experimental import pallas as pl
from jax.experimental.pallas import tpu as pltpu

HIDDEN = 128
VOCAB = 30000
MAX_POS = 512
N_TYPES = 2
LN_EPS = 1e-5  # PyTorch nn.LayerNorm default


def _pick_token_tile(seq_len):
    for ts in (512, 256, 128, 64, 32, 16, 8):
        if seq_len % ts == 0:
            return ts
    # TODO(synk): sequence lengths that are not a multiple of 8 would need padding.
    return seq_len


def _make_kernel(seq_len, tile):
    def kernel(ids_ref,                 # scalar prefetch: (B*S,) int32 in SMEM
               word_hbm,                # (VOCAB, H) f32 left in HBM (pl.ANY)
               pos_ref, tok_ref,        # (TS, H) f32, (2, H) f32 VMEM blocks
               tt_ref, mask_ref,        # (TS, 1) int32 VMEM blocks
               gamma_ref, beta_ref,     # (1, H) f32
               out_ref,                 # (TS, H) f32
               wbuf, gsem):             # scratch: (TS, H) VMEM + DMA semaphore
        b = pl.program_id(0)
        s = pl.program_id(1)
        base = b * seq_len + s * tile

        # 1) Batched word-embedding row gather: issue TS small HBM->VMEM DMAs,
        #    all signalling the same semaphore.
        def issue(t, carry):
            wid = ids_ref[base + t]
            pltpu.make_async_copy(word_hbm.at[wid], wbuf.at[t], gsem).start()
            return carry

        lax.fori_loop(0, tile, issue, 0)

        # 2) Compute everything that does not need the gathered rows while the
        #    DMAs are in flight.
        tt = (tt_ref[...] != 0).astype(jnp.float32)                   # (TS, 1)
        tok_rows = tok_ref[0:1, :] * (1.0 - tt) + tok_ref[1:2, :] * tt  # (TS, H)
        pos_plus_tok = pos_ref[...] + tok_rows                        # (TS, H)
        mask_f = (mask_ref[...] != 0).astype(jnp.float32)             # (TS, 1)

        # 3) Drain: every copy has identical shape, so wait once per row on the
        #    shared semaphore with an equal-shaped descriptor.
        def drain(t, carry):
            pltpu.make_async_copy(word_hbm.at[0], wbuf.at[0], gsem).wait()
            return carry

        lax.fori_loop(0, tile, drain, 0)

        x = wbuf[...] + pos_plus_tok                                  # (TS, H)

        # 4) LayerNorm over the hidden dim, fused single-pass reductions.
        mean = jnp.mean(x, axis=-1, keepdims=True)
        mean_sq = jnp.mean(x * x, axis=-1, keepdims=True)
        var = mean_sq - mean * mean
        inv = lax.rsqrt(var + LN_EPS)
        y = (x - mean) * inv * gamma_ref[...] + beta_ref[...]

        # 5) masked_fill_(attention_mask.unsqueeze(-1) == 0, 0) -> broadcast mul.
        out_ref[...] = y * mask_f

    return kernel


@jax.jit
def albert_embedding(input_ids, attention_mask, token_type_ids,
                     word_emb, pos_emb, tok_emb, gamma, beta):
    B, S = input_ids.shape
    H = word_emb.shape[1]
    TS = _pick_token_tile(S)
    assert S % TS == 0 and TS % 8 == 0, "sequence length must be a multiple of 8"
    n_tiles = S // TS

    ids_flat = input_ids.reshape(-1).astype(jnp.int32)
    tt3 = token_type_ids.astype(jnp.int32).reshape(B, S, 1)
    mask3 = attention_mask.astype(jnp.int32).reshape(B, S, 1)
    gamma2 = gamma.astype(jnp.float32).reshape(1, H)
    beta2 = beta.astype(jnp.float32).reshape(1, H)

    kernel = _make_kernel(S, TS)

    grid_spec = pltpu.PrefetchScalarGridSpec(
        num_scalar_prefetch=1,
        grid=(B, n_tiles),
        in_specs=[
            # word table stays in HBM; rows are DMA-gathered in-kernel.
            pl.BlockSpec(memory_space=pl.ANY),
            # contiguous slice of position rows for this token tile.
            pl.BlockSpec((TS, H), lambda b, s, ids: (s, 0)),
            # whole (2, H) token-type table, resident (constant block index).
            pl.BlockSpec(tuple(tok_emb.shape), lambda b, s, ids: (0, 0)),
            # token-type ids and attention mask as (TS, 1) vector blocks.
            pl.BlockSpec((None, TS, 1), lambda b, s, ids: (b, s, 0)),
            pl.BlockSpec((None, TS, 1), lambda b, s, ids: (b, s, 0)),
            # layernorm params.
            pl.BlockSpec((1, H), lambda b, s, ids: (0, 0)),
            pl.BlockSpec((1, H), lambda b, s, ids: (0, 0)),
        ],
        out_specs=pl.BlockSpec((None, TS, H), lambda b, s, ids: (b, s, 0)),
        scratch_shapes=[
            pltpu.VMEM((TS, H), jnp.float32),   # gathered word-embedding rows
            pltpu.SemaphoreType.DMA(()),        # shared gather semaphore
        ],
    )

    out = pl.pallas_call(
        kernel,
        out_shape=jax.ShapeDtypeStruct((B, S, H), jnp.float32),
        grid_spec=grid_spec,
        compiler_params=pltpu.CompilerParams(
            dimension_semantics=("parallel", "parallel"),   # shards across 2 TCs on v7x
            vmem_limit_bytes=32 * 1024 * 1024,
        ),
    )(ids_flat, word_emb, pos_emb, tok_emb, tt3, mask3, gamma2, beta2)
    return out


def reference(input_ids, attention_mask, token_type_ids,
              word_emb, pos_emb, tok_emb, gamma, beta):
    B, S = input_ids.shape
    x = word_emb[input_ids] + pos_emb[jnp.arange(S)][None, :, :] + tok_emb[token_type_ids]
    mean = jnp.mean(x, axis=-1, keepdims=True)
    var = jnp.mean((x - mean) ** 2, axis=-1, keepdims=True)
    y = (x - mean) / jnp.sqrt(var + LN_EPS) * gamma + beta
    return jnp.where(attention_mask[..., None] == 0, 0.0, y)


if __name__ == "__main__":
    B, S = 2, 8

    key = jax.random.PRNGKey(0)
    k_word, k_pos, k_tok, k_ids, k_tt, k_mask = jax.random.split(key, 6)

    # nn.Embedding default init: N(0, 1); LayerNorm: gamma=1, beta=0.
    word_emb = jax.random.normal(k_word, (VOCAB, HIDDEN), dtype=jnp.float32)
    pos_emb = jax.random.normal(k_pos, (MAX_POS, HIDDEN), dtype=jnp.float32)
    tok_emb = jax.random.normal(k_tok, (N_TYPES, HIDDEN), dtype=jnp.float32)
    gamma = jnp.ones((HIDDEN,), dtype=jnp.float32)
    beta = jnp.zeros((HIDDEN,), dtype=jnp.float32)

    input_ids = jax.random.randint(k_ids, (B, S), 0, VOCAB, dtype=jnp.int32)
    token_type_ids = jax.random.randint(k_tt, (B, S), 0, N_TYPES, dtype=jnp.int32)
    # attention mask with some padded (zero) positions
    attention_mask = (jax.random.uniform(k_mask, (B, S)) > 0.25).astype(jnp.int32)

    out = albert_embedding(input_ids, attention_mask, token_type_ids,
                           word_emb, pos_emb, tok_emb, gamma, beta)
    out = jax.block_until_ready(out)

    ref = reference(input_ids, attention_mask, token_type_ids,
                    word_emb, pos_emb, tok_emb, gamma, beta)
    assert out.shape == (B, S, HIDDEN)
    # Slightly relaxed tolerance: kernel uses the fused var = E[x^2] - mean^2
    # formulation (differences are ~1e-6 at H=128 f32).
    assert jnp.allclose(out, ref, atol=1e-4, rtol=1e-4), "mismatch vs JAX reference"

    print("KERNEL_OK")
</pallas_src>

<mosaic_0001>
module attributes {stable_mosaic.version = 11 : i64} {
  func.func @kernel(%arg0: i32, %arg1: i32, %arg2: memref<16xi32, #tpu.memory_space<smem>>, %arg3: memref<30000x128xf32, #tpu.memory_space<any>>, %arg4: memref<8x128xf32, #tpu.memory_space<vmem>>, %arg5: memref<2x128xf32, #tpu.memory_space<vmem>>, %arg6: memref<1x8x1xi32, #tpu.memory_space<vmem>>, %arg7: memref<1x8x1xi32, #tpu.memory_space<vmem>>, %arg8: memref<1x128xf32, #tpu.memory_space<vmem>>, %arg9: memref<1x128xf32, #tpu.memory_space<vmem>>, %arg10: memref<1x8x128xf32, #tpu.memory_space<vmem>>, %arg11: memref<8x128xf32, #tpu.memory_space<vmem>>, %arg12: memref<!tpu.dma_semaphore, #tpu.memory_space<semaphore_mem>>) attributes {dimension_semantics = [#tpu.dimension_semantics<parallel>, #tpu.dimension_semantics<parallel>], iteration_bounds = array<i64: 2, 1>, scalar_prefetch = 1 : i64, scratch_operands = 2 : i64, tpu.core_type = #tpu.core_type<tc>, window_params = [{}, {transform_indices = @transform_1, window_bounds = array<i64: 8, 128>}, {pipeline_mode = #tpu.pipeline_mode<synchronous>, transform_indices = @transform_2, window_bounds = array<i64: 2, 128>}, {transform_indices = @transform_3, window_bounds = array<i64: 1, 8, 1>}, {transform_indices = @transform_4, window_bounds = array<i64: 1, 8, 1>}, {pipeline_mode = #tpu.pipeline_mode<synchronous>, transform_indices = @transform_5, window_bounds = array<i64: 1, 128>}, {pipeline_mode = #tpu.pipeline_mode<synchronous>, transform_indices = @transform_6, window_bounds = array<i64: 1, 128>}, {transform_indices = @transform_7, window_bounds = array<i64: 1, 8, 128>}]} {
    %c8_i32 = arith.constant 8 : i32
    %0 = arith.muli %arg0, %c8_i32 : i32
    %c8_i32_0 = arith.constant 8 : i32
    %1 = arith.muli %arg1, %c8_i32_0 : i32
    %2 = arith.addi %0, %1 : i32
    %c0_i32 = arith.constant 0 : i32
    %c8_i32_1 = arith.constant 8 : i32
    %3 = arith.addi %c0_i32, %c8_i32_1 : i32
    %c1_i32 = arith.constant 1 : i32
    scf.for %arg13 = %c0_i32 to %3 step %c1_i32  : i32 {
      %61 = arith.addi %2, %arg13 : i32
      %62 = arith.index_cast %61 : i32 to index
      %63 = memref.load %arg2[%62] : memref<16xi32, #tpu.memory_space<smem>>
      %c0_i32_32 = arith.constant 0 : i32
      %64 = tpu.memref_slice %arg3[%63, %c0_i32_32] : memref<30000x128xf32, #tpu.memory_space<any>> -> memref<1x128xf32, #tpu.memory_space<any>>
      %65 = tpu.memref_squeeze %64 : memref<1x128xf32, #tpu.memory_space<any>> -> memref<128xf32, #tpu.memory_space<any>>
      %c0_i32_33 = arith.constant 0 : i32
      %66 = tpu.memref_slice %arg11[%arg13, %c0_i32_33] : memref<8x128xf32, #tpu.memory_space<vmem>> -> memref<1x128xf32, #tpu.memory_space<vmem>>
      %67 = tpu.memref_squeeze %66 : memref<1x128xf32, #tpu.memory_space<vmem>> -> memref<128xf32, #tpu.memory_space<vmem>>
      tpu.enqueue_dma source(%65 : memref<128xf32, #tpu.memory_space<any>>) target(%67 : memref<128xf32, #tpu.memory_space<vmem>>) target_semaphore(%arg12 : memref<!tpu.dma_semaphore, #tpu.memory_space<semaphore_mem>>)
    }
    %c8_i32_2 = arith.constant 8 : i32
    %c0 = arith.constant 0 : index
    %c0_3 = arith.constant 0 : index
    %c0_4 = arith.constant 0 : index
    %4 = vector.load %arg6[%c0, %c0_3, %c0_4] : memref<1x8x1xi32, #tpu.memory_space<vmem>>, vector<1x8x1xi32>
    %5 = vector.shape_cast %4 : vector<1x8x1xi32> to vector<8x1xi32>
    %c0_i32_5 = arith.constant 0 : i32
    %6 = vector.broadcast %c0_i32_5 : i32 to vector<8x1xi32>
    %7 = arith.cmpi ne, %5, %6 : vector<8x1xi32>
    %8 = arith.extui %7 : vector<8x1xi1> to vector<8x1xi32>
    %9 = arith.sitofp %8 : vector<8x1xi32> to vector<8x1xf32>
    %c0_6 = arith.constant 0 : index
    %c0_7 = arith.constant 0 : index
    %10 = vector.load %arg5[%c0_6, %c0_7] : memref<2x128xf32, #tpu.memory_space<vmem>>, vector<1x128xf32>
    %cst = arith.constant 1.000000e+00 : f32
    %11 = vector.broadcast %cst : f32 to vector<8x1xf32>
    %12 = arith.subf %11, %9 : vector<8x1xf32>
    %13 = vector.broadcast %10 : vector<1x128xf32> to vector<8x128xf32>
    %14 = vector.broadcast %12 : vector<8x1xf32> to vector<8x128xf32>
    %15 = arith.mulf %13, %14 : vector<8x128xf32>
    %c1 = arith.constant 1 : index
    %c0_8 = arith.constant 0 : index
    %16 = vector.load %arg5[%c1, %c0_8] : memref<2x128xf32, #tpu.memory_space<vmem>>, vector<1x128xf32>
    %17 = vector.broadcast %16 : vector<1x128xf32> to vector<8x128xf32>
    %18 = vector.broadcast %9 : vector<8x1xf32> to vector<8x128xf32>
    %19 = arith.mulf %17, %18 : vector<8x128xf32>
    %20 = arith.addf %15, %19 : vector<8x128xf32>
    %c0_9 = arith.constant 0 : index
    %c0_10 = arith.constant 0 : index
    %21 = vector.load %arg4[%c0_9, %c0_10] : memref<8x128xf32, #tpu.memory_space<vmem>>, vector<8x128xf32>
    %22 = arith.addf %21, %20 : vector<8x128xf32>
    %c0_11 = arith.constant 0 : index
    %c0_12 = arith.constant 0 : index
    %c0_13 = arith.constant 0 : index
    %23 = vector.load %arg7[%c0_11, %c0_12, %c0_13] : memref<1x8x1xi32, #tpu.memory_space<vmem>>, vector<1x8x1xi32>
    %24 = vector.shape_cast %23 : vector<1x8x1xi32> to vector<8x1xi32>
    %c0_i32_14 = arith.constant 0 : i32
    %25 = vector.broadcast %c0_i32_14 : i32 to vector<8x1xi32>
    %26 = arith.cmpi ne, %24, %25 : vector<8x1xi32>
    %27 = arith.extui %26 : vector<8x1xi1> to vector<8x1xi32>
    %28 = arith.sitofp %27 : vector<8x1xi32> to vector<8x1xf32>
    %c0_i32_15 = arith.constant 0 : i32
    %c8_i32_16 = arith.constant 8 : i32
    %29 = arith.addi %c0_i32_15, %c8_i32_16 : i32
    %c1_i32_17 = arith.constant 1 : i32
    scf.for %arg13 = %c0_i32_15 to %29 step %c1_i32_17  : i32 {
      %c0_i32_32 = arith.constant 0 : i32
      %c0_i32_33 = arith.constant 0 : i32
      %c0_i32_34 = arith.constant 0 : i32
      %61 = tpu.memref_slice %arg3[%c0_i32_32, %c0_i32_34] : memref<30000x128xf32, #tpu.memory_space<any>> -> memref<1x128xf32, #tpu.memory_space<any>>
      %62 = tpu.memref_squeeze %61 : memref<1x128xf32, #tpu.memory_space<any>> -> memref<128xf32, #tpu.memory_space<any>>
      %c0_i32_35 = arith.constant 0 : i32
      %63 = tpu.memref_slice %arg11[%c0_i32_33, %c0_i32_35] : memref<8x128xf32, #tpu.memory_space<vmem>> -> memref<1x128xf32, #tpu.memory_space<vmem>>
      %64 = tpu.memref_squeeze %63 : memref<1x128xf32, #tpu.memory_space<vmem>> -> memref<128xf32, #tpu.memory_space<vmem>>
      tpu.wait_dma2 semaphore(%arg12 : memref<!tpu.dma_semaphore, #tpu.memory_space<semaphore_mem>>) src(%62 : memref<128xf32, #tpu.memory_space<any>>) dst(%64 : memref<128xf32, #tpu.memory_space<vmem>>)
    }
    %c0_18 = arith.constant 0 : index
    %c0_19 = arith.constant 0 : index
    %30 = vector.load %arg11[%c0_18, %c0_19] : memref<8x128xf32, #tpu.memory_space<vmem>>, vector<8x128xf32>
    %31 = arith.addf %30, %22 : vector<8x128xf32>
    %cst_20 = arith.constant dense<0.000000e+00> : vector<8xf32>
    %32 = vector.multi_reduction <add>, %31, %cst_20 [1] : vector<8x128xf32> to vector<8xf32>
    %33 = vector.shape_cast %32 : vector<8xf32> to vector<8x1xf32>
    %cst_21 = arith.constant 1.280000e+02 : f32
    %34 = vector.broadcast %cst_21 : f32 to vector<8x1xf32>
    %35 = arith.divf %33, %34 : vector<8x1xf32>
    %36 = arith.mulf %31, %31 : vector<8x128xf32>
    %cst_22 = arith.constant dense<0.000000e+00> : vector<8xf32>
    %37 = vector.multi_reduction <add>, %36, %cst_22 [1] : vector<8x128xf32> to vector<8xf32>
    %38 = vector.shape_cast %37 : vector<8xf32> to vector<8x1xf32>
    %cst_23 = arith.constant 1.280000e+02 : f32
    %39 = vector.broadcast %cst_23 : f32 to vector<8x1xf32>
    %40 = arith.divf %38, %39 : vector<8x1xf32>
    %41 = arith.mulf %35, %35 : vector<8x1xf32>
    %42 = arith.subf %40, %41 : vector<8x1xf32>
    %cst_24 = arith.constant 9.99999974E-6 : f32
    %43 = vector.broadcast %cst_24 : f32 to vector<8x1xf32>
    %44 = arith.addf %42, %43 : vector<8x1xf32>
    %45 = math.rsqrt %44 : vector<8x1xf32>
    %46 = vector.broadcast %35 : vector<8x1xf32> to vector<8x128xf32>
    %47 = arith.subf %31, %46 : vector<8x128xf32>
    %48 = vector.broadcast %45 : vector<8x1xf32> to vector<8x128xf32>
    %49 = arith.mulf %47, %48 : vector<8x128xf32>
    %c0_25 = arith.constant 0 : index
    %c0_26 = arith.constant 0 : index
    %50 = vector.load %arg8[%c0_25, %c0_26] : memref<1x128xf32, #tpu.memory_space<vmem>>, vector<1x128xf32>
    %51 = vector.broadcast %50 : vector<1x128xf32> to vector<8x128xf32>
    %52 = arith.mulf %49, %51 : vector<8x128xf32>
    %c0_27 = arith.constant 0 : index
    %c0_28 = arith.constant 0 : index
    %53 = vector.load %arg9[%c0_27, %c0_28] : memref<1x128xf32, #tpu.memory_space<vmem>>, vector<1x128xf32>
    %54 = vector.broadcast %53 : vector<1x128xf32> to vector<8x128xf32>
    %55 = arith.addf %52, %54 : vector<8x128xf32>
    %56 = vector.broadcast %28 : vector<8x1xf32> to vector<8x128xf32>
    %57 = arith.mulf %55, %56 : vector<8x128xf32>
    %c0_29 = arith.constant 0 : index
    %c0_30 = arith.constant 0 : index
    %c0_31 = arith.constant 0 : index
    %58 = vector.load %arg10[%c0_29, %c0_30, %c0_31] : memref<1x8x128xf32, #tpu.memory_space<vmem>>, vector<1x8x128xf32>
    %59 = vector.shape_cast %58 : vector<1x8x128xf32> to vector<8x128xf32>
    %60 = vector.shape_cast %57 : vector<8x128xf32> to vector<1x8x128xf32>
    tpu.vector_store %arg10[%c0_29, %c0_30, %c0_31], %60 {strides = array<i32>} : memref<1x8x128xf32, #tpu.memory_space<vmem>>, vector<1x8x128xf32>,
    return
  }
  func.func @transform_1(%arg0: i32, %arg1: i32, %arg2: memref<16xi32, #tpu.memory_space<smem>>) -> (i32, i32) {
    %c0_i32 = arith.constant 0 : i32
    %c0_i32_0 = arith.constant 0 : i32
    return %arg1, %c0_i32 : i32, i32
  }
  func.func @transform_2(%arg0: i32, %arg1: i32, %arg2: memref<16xi32, #tpu.memory_space<smem>>) -> (i32, i32) {
    %c0_i32 = arith.constant 0 : i32
    %c0_i32_0 = arith.constant 0 : i32
    %c0_i32_1 = arith.constant 0 : i32
    return %c0_i32, %c0_i32_0 : i32, i32
  }
  func.func @transform_3(%arg0: i32, %arg1: i32, %arg2: memref<16xi32, #tpu.memory_space<smem>>) -> (i32, i32, i32) {
    %c0_i32 = arith.constant 0 : i32
    %c0_i32_0 = arith.constant 0 : i32
    return %arg0, %arg1, %c0_i32 : i32, i32, i32
  }
  func.func @transform_4(%arg0: i32, %arg1: i32, %arg2: memref<16xi32, #tpu.memory_space<smem>>) -> (i32, i32, i32) {
    %c0_i32 = arith.constant 0 : i32
    %c0_i32_0 = arith.constant 0 : i32
    return %arg0, %arg1, %c0_i32 : i32, i32, i32
  }
  func.func @transform_5(%arg0: i32, %arg1: i32, %arg2: memref<16xi32, #tpu.memory_space<smem>>) -> (i32, i32) {
    %c0_i32 = arith.constant 0 : i32
    %c0_i32_0 = arith.constant 0 : i32
    %c0_i32_1 = arith.constant 0 : i32
    return %c0_i32, %c0_i32_0 : i32, i32
  }
  func.func @transform_6(%arg0: i32, %arg1: i32, %arg2: memref<16xi32, #tpu.memory_space<smem>>) -> (i32, i32) {
    %c0_i32 = arith.constant 0 : i32
    %c0_i32_0 = arith.constant 0 : i32
    %c0_i32_1 = arith.constant 0 : i32
    return %c0_i32, %c0_i32_0 : i32, i32
  }
  func.func @transform_7(%arg0: i32, %arg1: i32, %arg2: memref<16xi32, #tpu.memory_space<smem>>) -> (i32, i32, i32) {
    %c0_i32 = arith.constant 0 : i32
    %c0_i32_0 = arith.constant 0 : i32
    return %arg0, %arg1, %c0_i32 : i32, i32, i32
  }
}

</mosaic_0001>

<bundles_post_ra>
// kernel: albert_embedding.1
= control target key start
LH: loop header
LB: loop body
LE: loop exit
PB: predicated region body
PF: predicated region fallthrough
CT: control target
= control target key end

     0   :  { %s1373_s0 = inlined_call_operand.vmem [shape: s32[16], index: 0, kind: input, shape index: {}]   ;;  %s1374_s1 = inlined_call_operand.hbm [shape: f32[30000,128], index: 1, kind: input, shape index: {}]   ;;  %s1375_s2 = inlined_call_operand.hbm [shape: f32[512,128], index: 2, kind: input, shape index: {}]   ;;  %s1376_s3 = inlined_call_operand.hbm [shape: f32[2,128], index: 3, kind: input, shape index: {}]   ;;  %s1377_s4 = inlined_call_operand.vmem [shape: s32[2,8,1], index: 4, kind: input, shape index: {}]   ;;  %s1378_s5 = inlined_call_operand.vmem [shape: s32[2,8,1], index: 5, kind: input, shape index: {}]   ;;  %s1379_s6 = inlined_call_operand.hbm [shape: f32[1,128], index: 6, kind: input, shape index: {}]   ;;  %s1380_s7 = inlined_call_operand.hbm [shape: f32[1,128], index: 7, kind: input, shape index: {}]   ;;  %s1381_s8 = inlined_call_operand.hbm [shape: f32[2,8,128], index: 8, kind: output, shape index: {}]  }
   0x1   :  { %1390 = sst [smem:[#allocation29_spill]] %s1375_s2  ;;  %s13_s29 = sshll.u32 %s1373_s0, 4  ;;  %s14_s29 = int_to_ptr.vmem [resolvable:$true] %s13_s29 }
   0x2   :  { %1391 = sst [smem:[#allocation30_spill]] %s1376_s3  ;;  %s784_s30 = scalar_lea.vmem %s14_s29, 16 }
   0x3   :  { %p785_p0 = scmp.ne.s32.totalorder %s14_s29, %s784_s30  ;;  %p789_p1 = scmp.lt.s32.totalorder %s14_s29, %s14_s29 }
   0x4   :  { %p790_p2 = scmp.lt.s32.totalorder %s784_s30, %s784_s30 }
   0x6   :  { %p791_p3 = por %p790_p2, %p789_p1 }
   0x8   :  { %p792_p4 = pnand %p791_p3, %p785_p0 }
   0xa   :  { %795 = shalt.err (!%p792_p4)  }
   0xb   :  { %s1044_s9 = smov [#allocation5]  }
   0xc   :  { %16 = dma.vmem_to_smem %s14_s29, 16, %s1044_s9, [#allocation4] }
   0xd   :  { %992 = dma.done.wait [#allocation4], 16 }
   0xe   :  { %993 = vsyncadd [#allocation4], 4294967280 }
   0xf   :  { %18 = sfence }
  0x10   :  { %19 = vsyncpa [#allocation7], 0 }
  0x11   :  { %20 = vsyncpa [#allocation10], 0 }
  0x12   :  { %21 = vsyncpa [#allocation13], 0 }
  0x13   :  { %22 = vsyncpa [#allocation8], 0 }
  0x14   :  { %24 = vsyncpa [#allocation8 + $0x1], 0  ;;  %s1101_s10 = smov 0   ;;  %s1103_s0 = smov 0  }
  0x15   :  { %s1105_s11 = smov 0   ;;  %s1107_s12 = smov 0  }
  0x16   :  { %s1109_s13 = smov 0   ;;  %s1111_s14 = smov 0  }
  0x17 LB: > { %1392 = sst [smem:[#allocation25_spill]] %s1022_s11  ;;  %s635_s15 = sadd.s32 4294967295, %s1034_s14   ;;  %s1034_s14 = sphi %s1111_s14, %s30_s14   ;;  %s1030_s13 = sphi %s1109_s13, %s1414_s13   ;;  %s1026_s12 = sphi %s1107_s12, %s1413_s12   ;;  %s1022_s11 = sphi %s1105_s11, %s1412_s11   ;;  %s1018_s0 = sphi %s1103_s0, %s1416_s0   ;;  %s1014_s10 = sphi %s1101_s10, %s1415_s10  }
  0x18   : > { %1393 = sst [smem:[#allocation26_spill]] %s1030_s13  ;;  %s636_s16 = sadd.s32 4294967294, %s1034_s14  }
  0x19   : > { %s42_s17 = sadd.s32 1, %s1030_s13  ;;  %s196_s18 = sadd.s32 1, %s1022_s11 }
  0x1a   : > { %p44_p5 = scmp.ge.s32.totalorder %s42_s17, 2  ;;  %p206_p6 = scmp.ne.s32.totalorder %s1022_s11, %s1018_s0 }
  0x1b   : > { %p207_p7 = scmp.eq.s32.totalorder %s635_s15, 1  ;;  %p212_p8 = scmp.ne.s32.totalorder %s1018_s0, %s1014_s10 }
  0x1c   : > { %s1418_s17 = smov (%p44_p5, %s42_s17), 0  ;;  %p213_p10 = scmp.eq.s32.totalorder %s636_s16, 1 }
  0x1d   : > { %1394 = sst [smem:[#allocation27_spill]] %s1418_s17  ;;  %p1141_p9 = por %p207_p7, %p206_p6 }
  0x1e   : > { %s191_s20 = ssub.s32 %s1030_s13, %s1418_s17  ;;  %p637_p11 = scmp.ge.s32.totalorder %s1034_s14, 1 }
  0x1f   : > { %s1395_s19 = scalar_select %p1141_p9, 1, 0 }
  0x20   : > { %p194_p12 = scmp.eq.s32.totalorder %s191_s20, 0  ;;  %p1148_p13 = por %p213_p10, %p212_p8 }
  0x21   : > { %p220_p0 = scmp.lt.s32.totalorder %s1034_s14, 3  ;;  %p1160_p2 = scmp.eq.s32.totalorder %s635_s15, 0 }
  0x22   : > { %s1396_s21 = scalar_select %p1148_p13, 1, 0 }
  0x23   : > { %s1154_s22 = scalar_select %p194_p12, %s1022_s11, %s196_s18  }
  0x24   : > { %p1156_p1 = pnand %p637_p11, %p220_p0  ;;  %s1045_s25 = smov [#allocation9]  }
  0x25   : > { %1397 = sst [smem:[#allocation28_spill]] %s1154_s22  ;;  %s246_s26 = sshll.u32 %s1045_s25, 4  ;;  %s247_s26 = int_to_ptr.vmem [resolvable:$true] %s246_s26 }
  0x26   : > { %s1398_s23 = scalar_select %p1156_p1, 1, 0 }
  0x27   : > { %s1399_s24 = scalar_select %p1160_p2, 1, 0 }
  0x28   : > { %p682_p3 = pneg %p1156_p1  ;;  %s1046_s28 = smov [#allocation6]  }
  0x29   : > { %s235_s29 = sshll.u32 %s1046_s28, 4  ;;  %s1401_s3 = sld [smem:[#allocation30_spill]]  ;;  %s1172_s29 = int_to_ptr.vmem [resolvable:$true] %s235_s29 }
  0x2a   : > { %p1168_p4 = pnand %p1160_p2, %p682_p3 }
  0x2c   : > { %p1182_p6 = pneg %p1168_p4 }
  0x2f   : > { %s796_s15 = scalar_lea.hbm %s1401_s3, 32 }
  0x30   : > { %p797_p5 = scmp.ne.s32.totalorder %s1401_s3, %s796_s15  ;;  %p803_p10 = scmp.lt.u32.totalorder %s796_s15, %s1401_s3 }
  0x32   : > { %p799_p7 = pnand %p1182_p6, %p797_p5 }
  0x34   : > { %p800_p8 = pneg %p799_p7 }
  0x36   : > { %p805_p11 = pnand %p803_p10, %p800_p8 }
  0x38   : > { %808 = shalt.err (!%p805_p11)
}
  0x39   : > { %s809_s30 = scalar_lea.vmem %s247_s26, 32  ;;  %p817_p13 = scmp.lt.s32.totalorder %s247_s26, %s247_s26 }
  0x3a   : > { %p810_p12 = scmp.ne.s32.totalorder %s247_s26, %s809_s30  ;;  %p818_p9 = scmp.lt.s32.totalorder %s809_s30, %s809_s30 }
  0x3c   : > { %p812_p0 = pnand %p810_p12, %p1182_p6  ;;  %p819_p2 = por %p818_p9, %p817_p13 }
  0x3e   : > { %p813_p3 = pneg %p812_p0 }
  0x40   : > { %p820_p1 = pnand %p819_p2, %p813_p3 }
  0x42   : > { %823 = shalt.err (!%p820_p1)
}
  0x43   : > { %688 = dma.hbm_to_vmem [thread:$0]  (!%p1168_p4), %s1401_s3, 32, %s247_s26, [#allocation10]  }
  0x44   : > { %s1403_s2 = sld [smem:[#allocation29_spill]] }
  0x4a   : > { %s824_s25 = scalar_lea.hbm %s1403_s2, 128  ;;  %s829_s22 = scalar_lea.hbm %s1403_s2, 8192 }
  0x4b   : > { %p825_p5 = scmp.ne.s32.totalorder %s1403_s2, %s824_s25  ;;  %p830_p13 = scmp.lt.u32.totalorder %s829_s22, %s824_s25 }
  0x4c   : > { %p831_p1 = scmp.lt.u32.totalorder %s824_s25, %s1403_s2 }
  0x4d   : > { %p827_p7 = pnand %p825_p5, %p1182_p6 }
  0x4e   : > { %p832_p2 = por %p831_p1, %p830_p13 }
  0x4f   : > { %p828_p9 = pneg %p827_p7 }
  0x51   : > { %p833_p8 = pnand %p832_p2, %p828_p9 }
  0x53   : > { %836 = shalt.err (!%p833_p8)
}
  0x54   : > { %s837_s17 = scalar_lea.vmem %s1172_s29, 128  ;;  %p845_p0 = scmp.lt.s32.totalorder %s1172_s29, %s1172_s29 }
  0x55   : > { %p838_p10 = scmp.ne.s32.totalorder %s1172_s29, %s837_s17  ;;  %p846_p3 = scmp.lt.s32.totalorder %s837_s17, %s837_s17 }
  0x57   : > { %p840_p11 = pnand %p838_p10, %p1182_p6  ;;  %p847_p5 = por %p846_p3, %p845_p0 }
  0x59   : > { %p841_p12 = pneg %p840_p11 }
  0x5b   : > { %p848_p7 = pnand %p847_p5, %p841_p12 }
  0x5d   : > { %851 = shalt.err (!%p848_p7)
}
  0x5e   : > { %685 = dma.hbm_to_vmem [thread:$0]  (!%p1168_p4), %s1403_s2, 128, %s1172_s29, [#allocation7]  }
  0x5f   : > { %s1047_s22 = smov [#allocation11]   ;;  %s1048_s16 = smov [#allocation12]  }
  0x60   : > { %s257_s26 = sshll.u32 %s1047_s22, 4  ;;  %s268_s15 = sshll.u32 %s1048_s16, 4  ;;  %s258_s26 = int_to_ptr.vmem [resolvable:$true] %s257_s26  ;;  %s269_s15 = int_to_ptr.vmem [resolvable:$true] %s268_s15 }
  0x61   : > { %s852_s28 = scalar_lea.hbm %s1379_s6, 16 }
  0x62   : > { %p853_p9 = scmp.ne.s32.totalorder %s1379_s6, %s852_s28  ;;  %p859_p2 = scmp.lt.u32.totalorder %s852_s28, %s1379_s6 }
  0x64   : > { %p855_p13 = pnand %p853_p9, %p1182_p6 }
  0x66   : > { %p856_p1 = pneg %p855_p13 }
  0x68   : > { %p861_p8 = pnand %p859_p2, %p856_p1 }
  0x6a   : > { %864 = shalt.err (!%p861_p8)
}
  0x6b   : > { %s865_s29 = scalar_lea.vmem %s258_s26, 16  ;;  %s872_s13 = scalar_lea.vmem %s258_s26, 32 }
  0x6c   : > { %p866_p10 = scmp.ne.s32.totalorder %s258_s26, %s865_s29  ;;  %p873_p0 = scmp.lt.s32.totalorder %s258_s26, %s258_s26 }
  0x6d   : > { %p874_p3 = scmp.lt.s32.totalorder %s872_s13, %s865_s29 }
  0x6e   : > { %p868_p11 = pnand %p866_p10, %p1182_p6 }
  0x6f   : > { %p875_p5 = por %p874_p3, %p873_p0 }
  0x70   : > { %p869_p12 = pneg %p868_p11 }
  0x72   : > { %p876_p7 = pnand %p875_p5, %p869_p12 }
  0x74   : > { %879 = shalt.err (!%p876_p7)
}
  0x75   : > { %691 = dma.hbm_to_vmem [thread:$0]  (!%p1168_p4), %s1379_s6, 16, %s258_s26, [#allocation10]  }
  0x76   : > { %s880_s28 = scalar_lea.hbm %s1380_s7, 16 }
  0x77   : > { %p881_p9 = scmp.ne.s32.totalorder %s1380_s7, %s880_s28  ;;  %p887_p2 = scmp.lt.u32.totalorder %s880_s28, %s1380_s7 }
  0x79   : > { %p883_p13 = pnand %p881_p9, %p1182_p6 }
  0x7b   : > { %p884_p1 = pneg %p883_p13 }
  0x7d   : > { %p889_p8 = pnand %p887_p2, %p884_p1 }
  0x7f   : > { %892 = shalt.err (!%p889_p8)
}
  0x80   : > { %s893_s29 = scalar_lea.vmem %s269_s15, 16  ;;  %s900_s26 = scalar_lea.vmem %s269_s15, 32 }
  0x81   : > { %p894_p10 = scmp.ne.s32.totalorder %s269_s15, %s893_s29  ;;  %p901_p0 = scmp.lt.s32.totalorder %s269_s15, %s269_s15 }
  0x82   : > { %p902_p3 = scmp.lt.s32.totalorder %s900_s26, %s893_s29 }
  0x83   : > { %p896_p11 = pnand %p894_p10, %p1182_p6 }
  0x84   : > { %p903_p5 = por %p902_p3, %p901_p0 }
  0x85   : > { %p897_p12 = pneg %p896_p11 }
  0x87   : > { %p904_p7 = pnand %p903_p5, %p897_p12 }
  0x89   : > { %907 = shalt.err (!%p904_p7)
}
  0x8a   : > { %694 = dma.hbm_to_vmem [thread:$0]  (!%p1168_p4), %s1380_s7, 16, %s269_s15, [#allocation13]  }
  0x8b   : > { %p1404_p9 = scmp.ne.s32.totalorder %s1398_s23, 0 }
  0x8c   : > { %p1405_p13 = scmp.ne.s32.totalorder (!%p1404_p9), %s1399_s24, 0 }
  0x8d   : > { %301 = sbr.rel (%p1404_p9) target bundleno = 524 (0x20c), region = 44 }
  0x94   : > { %995 = dma.done.wait (%p1405_p13), [#allocation7], 128  }
  0x95   : > { %997 = vsyncadd (%p1405_p13), [#allocation7], 4294967168 }
  0x96   : > { %999 = dma.done.wait (%p1405_p13), [#allocation10], 48  }
  0x97   : > { %1001 = vsyncadd (%p1405_p13), [#allocation10], 4294967248 }
  0x98   : > { %1003 = dma.done.wait (%p1405_p13), [#allocation13], 16  }
  0x99   : > { %1005 = vsyncadd (%p1405_p13), [#allocation13], 4294967280  ;;  %s1389_s23 = sand.u32 1, %s1018_s0   ;;  %p352_p4 = scmp.lt.s32.totalorder %s1026_s12, 1 }
  0x9a   : > { %s1278_s27 = sshll.u32 %s1389_s23, 3  ;;  %s651_s20 = sshll.u32 %s1026_s12, 3 }
  0x9b   : > { %s353_s15 = scalar_select %p352_p4, %s1026_s12, 1 }
  0x9c   : > { %s1293_s11 = smov 0  }
  0x9d   : > { %s649_s16 = sshll.u32 %s353_s15, 3 }
  0x9e   : > { %s1285_s28 = scalar_lea.vmem %s1377_s4, %s649_s16  ;;  %s1290_s9 = scalar_lea.vmem %s1378_s5, %s649_s16 }
  0x9f LB: >> { %s375_s29 = sadd.s32 %s1038_s11, %s651_s20  ;;  %s379_s13 = scalar_lea.vmem [#allocation2], %s1038_s11  ;;  %s1038_s11 = sphi %s1293_s11, %s374_s11  }
  0xa0   : >> { %s376_s26 = sld [smem:[#allocation5 + %s375_s29]]  ;;  %s387_s22 = sshll.u32 %s379_s13, 4  ;;  %s388_s22 = int_to_ptr.vmem [resolvable:$true] %s387_s22 }
  0xa1   : >> { %s910_s17 = scalar_lea.hbm %s1374_s1, 480000 }
  0xa6   : >> { %s652_s15 = sshll.u32 %s376_s26, 4 }
  0xa7   : >> { %s378_s25 = scalar_lea.hbm %s1374_s1, %s652_s15 }
  0xa8   : >> { %s908_s24 = scalar_lea.hbm %s378_s25, 16  ;;  %p911_p1 = scmp.lt.u32.totalorder %s378_s25, %s1374_s1 }
  0xa9   : >> { %p909_p6 = scmp.ne.s32.totalorder %s378_s25, %s908_s24  ;;  %p912_p2 = scmp.lt.u32.totalorder %s910_s17, %s908_s24 }
  0xaa   : >> { %p914_p10 = scmp.lt.u32.totalorder %s908_s24, %s378_s25 }
  0xab   : >> { %p913_p8 = por %p912_p2, %p911_p1 }
  0xad   : >> { %p915_p11 = por %p914_p10, %p913_p8 }
  0xaf   : >> { %p916_p12 = pnand %p915_p11, %p909_p6 }
  0xb1   : >> { %919 = shalt.err (!%p916_p12)  }
  0xb2   : >> { %s920_s29 = scalar_lea.vmem %s388_s22, 16  ;;  %s1049_s26 = smov [#allocation2]  }
  0xb3   : >> { %p921_p0 = scmp.ne.s32.totalorder %s388_s22, %s920_s29  ;;  %s922_s13 = sshll.u32 %s1049_s26, 4  ;;  %s923_s13 = int_to_ptr.vmem [resolvable:$false] %s922_s13 }
  0xb4   : >> { %s924_s15 = scalar_lea.vmem %s923_s13, 128  ;;  %p925_p3 = scmp.lt.s32.totalorder %s388_s22, %s923_s13 }
  0xb5   : >> { %p926_p5 = scmp.lt.s32.totalorder %s924_s15, %s920_s29 }
  0xb7   : >> { %p927_p7 = por %p926_p5, %p925_p3 }
  0xb9   : >> { %p928_p9 = pnand %p927_p7, %p921_p0 }
  0xbb   : >> { %931 = shalt.err (!%p928_p9)  }
  0xbc   : >> { %390 = dma.hbm_to_vmem [thread:$0]  %s378_s25, 16, %s388_s22, [#allocation3] }
  0xbd   : >> { %s374_s11 = sadd.s32 1, %s1038_s11  }
  0xbe   : >> { %p371_p13 = scmp.ge.s32.totalorder %s374_s11, 8  }
  0xbf   : > { %v391_v0 = vld [vmem:[%s1285_s28] sm:$0xff] (%p371_p13)  ;;  %v1050_v2 = vmov (%p371_p13), 0   ;;  %v1051_v3 = vmov (%p371_p13), 0.0   ;;  %v654_v8 = vld [vmem:[#allocation9] ss:$0 sm:$0xff] (%p371_p13)  ;;  %v419_v13 = vld [vmem:[#allocation6] sm:$0xff] (%p371_p13) }
  0xc0   : > { %373 = sbr.rel (!%p371_p13) target bundleno = 159 (0x9f), region = 120  ;;  %v421_v1 = vld [vmem:[%s1290_s9] sm:$0xff] (%p371_p13)  ;;  %779 = vset.pattern.permute.xlu0 (%p371_p13), %v1050_v2  ;;  %vm392_vm0 = vcmp.ne.s32.totalorder (%p371_p13), %v391_v0, 0  ;;  %v655_v9 = vld [vmem:[#allocation9 + $0x1] ss:$0 sm:$0xff] (%p371_p13)  ;;  %s1040_s2 = smov (%p371_p13), 0  }
  0xc1   : > { %vm422_vm1 = vcmp.ne.s32.totalorder (%p371_p13), %v421_v1, 0  ;;  %v653_v4 = vsel (%p371_p13), %vm392_vm0, 1.0, %v1051_v3 }
  0xc2   : > { %v656_v5 = vsel (%p371_p13), %vm422_vm1, 1.0, %v1051_v3  ;;  %v396_v6 = vsub.f32 (%p371_p13), 1.0, %v653_v4 }
  0xc4   : > { %403 = vperm.xlu0 (%p371_p13), %779, %v396_v6  }
  0xc8   : > { %414 = vperm.xlu0 %779, %v653_v4  }
 0x143   : > { %v404_v7 = vpop.permute.xlu0 %403 }
 0x144   : > { %v406_v11 = vmul.f32 %v654_v8, %v404_v7 }
 0x147   : > { %v415_v10 = vpop.permute.xlu0 %414 }
 0x148   : > { %v417_v12 = vmul.f32 %v655_v9, %v415_v10 }
 0x14a   : > { %v418_v14 = vadd.f32 %v417_v12, %v406_v11 }
 0x14c   : > { %v420_v15 = vadd.f32 %v419_v13, %v418_v14 }
 0x14d LB: >> { %1006 = dma.done.wait [#allocation3], 16  ;;  %s1042_s2 = sphi %s1040_s2, %s430_s2  }
 0x14e   : >> { %1007 = vsyncadd [#allocation3], 4294967280  ;;  %s430_s2 = sadd.s32 1, %s1042_s2  }
 0x14f   : >> { %p427_p4 = scmp.ge.s32.totalorder %s430_s2, 8  }
 0x150   : > { %v433_v16 = vld [vmem:[#allocation2] sm:$0xff] (%p427_p4)  ;;  %780 = vset.pattern.permute.xlu1 (%p427_p4), %v1050_v2  ;;  %781 = vset.pattern.permute.xlu0 (%p427_p4), %v1050_v2  ;;  %v657_v28 = vld [vmem:[#allocation11] ss:$0 sm:$0xff] (%p427_p4)  ;;  %v658_v30 = vld [vmem:[#allocation12] ss:$0 sm:$0xff] (%p427_p4)  ;;  %s660_s3 = sshll.u32 (%p427_p4), %s1026_s12, 7 }
 0x151   : > { %429 = sbr.rel (!%p427_p4) target bundleno = 333 (0x14d), region = 131  ;;  %v434_v17 = vadd.f32 (%p427_p4), %v433_v16, %v420_v15  ;;  %467 = vperm.xlu1 (%p427_p4), %780, %v656_v5   ;;  %s1406_s23 = scalar_lea.vmem (%p427_p4), [#allocation14], %s1278_s27 }
 0x152   : > { %s487_s20 = sshll.u32 (%p427_p4), %s1406_s23, 4  ;;  %s1322_s17 = scalar_lea.hbm (%p427_p4), %s1381_s8, %s660_s3  ;;  %s1324_s20 = int_to_ptr.vmem [resolvable:$true] %s487_s20 }
 0x153   : > { %435 = vadd.xlane.f32.xlu0 (%p427_p4), %v434_v17  ;;  %v439_v18 = vmul.f32 (%p427_p4), %v434_v17, %v434_v17  ;;  %s1407_s11 = smov (%p427_p4), %s1406_s23  ;;  %s1408_s22 = sand.u32 (%p427_p4), 1, %s1018_s0  }
 0x154   : > { %s473_s16 = scalar_lea.sflag (%p427_p4), [#allocation8], %s1408_s22  ;;  %s932_s18 = scalar_lea.vmem (%p427_p4), %s1324_s20, 128 }
 0x155   : > { %p933_p6 = scmp.ne.s32.totalorder (%p427_p4), %s1324_s20, %s932_s18  ;;  %p1409_p1 = scmp.ne.s32.totalorder (%p427_p4), %s1395_s19, 0 }
 0x156   : > { %s1052_s12 = smov (%p427_p4), [#allocation14]  }
 0x157   : > { %440 = vadd.xlane.f32.xlu0 (%p427_p4), %v439_v18  ;;  %p934_p2 = pnand (%p427_p4), %p933_p6, %p1409_p1  ;;  %s936_s25 = sshll.u32 (%p427_p4), %s1052_s12, 4  ;;  %s937_s25 = int_to_ptr.vmem [resolvable:$false] %s936_s25 }
 0x158   : > { %s938_s24 = scalar_lea.vmem %s937_s25, 256  ;;  %p939_p10 = scmp.lt.s32.totalorder %s1324_s20, %s937_s25 }
 0x159   : > { %p935_p8 = pneg %p934_p2  ;;  %p940_p11 = scmp.lt.s32.totalorder %s938_s24, %s932_s18 }
 0x15b   : > { %p941_p12 = por %p940_p11, %p939_p10 }
 0x15d   : > { %p942_p0 = pnand %p941_p12, %p935_p8 }
 0x1d0   : > { %v468_v32 = vpop.permute.xlu1 %467 }
 0x1e0   : > { %v436_v19 = vpop.xlane.xlu0 %435 }
 0x1e1   : > { %v438_v20 = vmul.f32 0.0078125, %v436_v19 }
 0x1e3   : > { %v443_v22 = vmul.f32 %v438_v20, %v438_v20  ;;  %v447_v26 = vsub.f32 %v434_v17, %v438_v20 }
 0x1e4   : > { %v441_v21 = vpop.xlane.xlu0 %440 }
 0x1e5   : > { %v442_v23 = vmul.f32 0.0078125, %v441_v21 }
 0x1e7   : > { %v444_v24 = vsub.f32 %v442_v23, %v443_v22 }
 0x1e9   : > { %v445_v25 = vadd.f32 1e-05, %v444_v24 }
 0x1eb   : > { %782 = vrsqrt.f32 %v445_v25 }
 0x1f5   : > { %v783_v27 = vpop.eup %782 }
 0x1f6   : > { %v448_v29 = vmul.f32 %v783_v27, %v447_v26 }
 0x1f8   : > { %v456_v31 = vmul.f32 %v657_v28, %v448_v29 }
 0x1fa   : > { %v464_v33 = vadd.f32 %v658_v30, %v456_v31 }
 0x1fc   : > { %v470_v34 = vmul.f32 %v468_v32, %v464_v33 }
 0x1fe   : > { %471 = vst [vmem:[%s1407_s11] sm:$0xff] %v470_v34 }
 0x1ff   : > { %945 = shalt.err (!%p942_p0)
}
 0x200   : > { %s946_s27 = scalar_lea.hbm %s1322_s17, 128  ;;  %s950_s26 = scalar_lea.hbm %s1381_s8, 256 }
 0x201   : > { %p947_p3 = scmp.ne.s32.totalorder %s1322_s17, %s946_s27  ;;  %p951_p9 = scmp.lt.u32.totalorder %s1322_s17, %s1381_s8 }
 0x202   : > { %p952_p13 = scmp.lt.u32.totalorder %s950_s26, %s946_s27  ;;  %p954_p6 = scmp.lt.u32.totalorder %s946_s27, %s1322_s17 }
 0x203   : > { %p948_p5 = pnand %p947_p3, %p1409_p1 }
 0x204   : > { %p953_p4 = por %p952_p13, %p951_p9 }
 0x205   : > { %p949_p7 = pneg %p948_p5 }
 0x206   : > { %p955_p2 = por %p954_p6, %p953_p4 }
 0x208   : > { %p956_p8 = pnand %p955_p2, %p949_p7 }
 0x20a   : > { %959 = shalt.err (!%p956_p8)
}
 0x20b   : > { %680 = dma.vmem_to_hbm [thread:$0]  (%p1409_p1), %s1324_s20, 128, %s1322_s17, %s473_s16  }
 0x20c PF: > { %p707_p10 = scmp.ge.s32.totalorder %s1034_s14, 2  ;;  %s499_s2 = sand.u32 1, %s1014_s10  }
 0x20d   : > { %p1410_p11 = scmp.ne.s32.totalorder %s1396_s21, 0  ;;  %s500_s3 = scalar_lea.sflag [#allocation8], %s499_s2 }
 0x20f   : > { %p696_p12 = pnand %p707_p10, %p1410_p11 }
 0x211   : > { %1009 = dma.done.wait (!%p696_p12), %s500_s3, 128  }
 0x212   : > { %1011 = vsyncadd (!%p696_p12), %s500_s3, 4294967168  ;;  %s30_s14 = sadd.s32 1, %s1034_s14   ;;  %s1411_s23 = sld [smem:[#allocation25_spill]] }
 0x213   : > { %p27_p0 = scmp.ge.s32.totalorder %s30_s14, 4   ;;  %s1412_s11 = sld [smem:[#allocation28_spill]] }
 0x214   : > { %s1413_s12 = sld [smem:[#allocation26_spill]]  ;;  %s1414_s13 = sld [smem:[#allocation27_spill]] }
 0x215   : > { %s1415_s10 = smov %s1018_s0  ;;  %29 = sbr.rel (!%p27_p0) target bundleno = 23 (0x17), region = 142 }
 0x218   : > { %s1416_s0 = smov %s1411_s23 }
 0x21c   :  { %505 = vsyncpa [#allocation7], 1 }
 0x21d   :  { %507 = vsyncpa [#allocation7 + $0x1], 1 }
 0x21e   :  { %508 = vsyncpa [#allocation10], 1 }
 0x21f   :  { %509 = vsyncpa [#allocation13], 1 }
 0x220   :  { %510 = vsyncpa [#allocation8], 1 }
 0x221   :  { %512 = vsyncpa [#allocation8 + $0x1], 1 }
 0x222   :  { %513 = vsyncmov [#allocation3] }
 0x225   :  { %s514_s19 = vpop.sfrf %513 }
 0x226   :  { %p663_p1 = scmp.ne.s32.totalorder %s514_s19, 0 }
 0x228   :  { %518 = shalt.err (%p663_p1)  }

</bundles_post_ra>
